<compile_context>
chip_gen: v7x
topology: tpu7x:2x2x1
jax: 0.10.0
libtpu: 0.0.40
codegen_flags: <defaults>
</compile_context>

<pallas_src>
import functools

import jax
import jax.numpy as jnp
from jax import lax
from jax.experimental import pallas as pl
from jax.experimental.pallas import tpu as pltpu

NUM_JOINTS = 21


def _dis_loss_kernel_whole(p_ref, t_ref, out_ref, *, inv_n):
    # p_ref, t_ref: (3, N) in VMEM (any float dtype); out_ref: (1, 1) f32 in SMEM.
    p = p_ref[...].astype(jnp.float32)
    t = t_ref[...].astype(jnp.float32)
    diff = p - t                                            # (3, N)
    sq = jnp.sum(diff * diff, axis=0, keepdims=True)        # (1, N) sublane reduce (2 adds)
    dist = jnp.sqrt(sq)                                     # (1, N) EUP, full-lane vregs
    out_ref[0, 0] = jnp.sum(dist) * inv_n                   # mean over all B*21 joints


def _dis_loss_kernel_grid(p_ref, t_ref, out_ref, acc_ref, *, inv_n, n_valid, tile):
    # p_ref, t_ref: (3, tile) blocks; out_ref: (1, 1) f32 block (written once);
    # acc_ref: (1, tile) f32 VMEM scratch holding lane-parallel partial sums.
    i = pl.program_id(0)

    @pl.when(i == 0)
    def _():
        acc_ref[...] = jnp.zeros_like(acc_ref)

    p = p_ref[...].astype(jnp.float32)                      # in-kernel upcast (bf16 OK)
    t = t_ref[...].astype(jnp.float32)
    diff = p - t                                            # (3, tile)
    sq = jnp.sum(diff * diff, axis=0, keepdims=True)        # (1, tile)

    # Mask columns of the ragged final tile (global joint index >= n_valid).
    # Select BEFORE sqrt so stale/garbage OOB data can never contribute or NaN.
    col = lax.broadcasted_iota(jnp.int32, (1, tile), 1) + i * tile
    sq = jnp.where(col < n_valid, sq, 0.0)

    acc_ref[...] += jnp.sqrt(sq)                            # plain VPU add, no XLU per step

    @pl.when(i == pl.num_programs(0) - 1)
    def _():
        # Single cross-lane reduce + scalar store, only on the last step.
        out_ref[...] = jnp.sum(acc_ref[...], keepdims=True) * inv_n


def get_dis_loss(pred, target, *, tile_joints=65536,
                 whole_array_vmem_budget=4 * 1024 * 1024):
    """pred: (B, 21, 3), target: (B, 63) (or (B, 21, 3)). Returns scalar f32 loss."""
    B = pred.shape[0]
    n = B * NUM_JOINTS

    # Lane-dense (3, N) layout: the joint axis maps to the 128-wide lane dim.
    p = jnp.transpose(pred.reshape(n, 3))                   # (3, n)
    t = jnp.transpose(target.reshape(n, 3))                 # (3, n)
    inv_n = 1.0 / float(n)                                  # compile-time constant

    # Padded VMEM footprint of one (3, n) input block: sublanes pad 3 -> 8 (f32)
    # or 3 -> 16 (bf16), lanes pad to a multiple of 128 -> 32 * roundup(n, 128)
    # bytes either way.  Gate the whole-array fast path on this, not on n.
    n_lanes = pl.cdiv(n, 128) * 128
    vmem_per_input = 32 * n_lanes

    if 2 * vmem_per_input <= whole_array_vmem_budget:
        # Typical hand-pose batch sizes: launch/DMA-overhead bound -> one shot.
        out = pl.pallas_call(
            functools.partial(_dis_loss_kernel_whole, inv_n=inv_n),
            out_shape=jax.ShapeDtypeStruct((1, 1), jnp.float32),
            in_specs=[
                pl.BlockSpec(memory_space=pltpu.MemorySpace.VMEM),
                pl.BlockSpec(memory_space=pltpu.MemorySpace.VMEM),
            ],
            out_specs=pl.BlockSpec(memory_space=pltpu.MemorySpace.SMEM),
        )(p, t)
        return out[0, 0]

    # Very large B: 1-D reduction grid over the joint axis with double-buffered
    # lane-dense tiles; ragged tail masked in-kernel (no host-side jnp.pad copy).
    tile = tile_joints
    grid_steps = pl.cdiv(n, tile)
    out = pl.pallas_call(
        functools.partial(_dis_loss_kernel_grid, inv_n=inv_n, n_valid=n, tile=tile),
        out_shape=jax.ShapeDtypeStruct((1, 1), jnp.float32),
        grid_spec=pltpu.PrefetchScalarGridSpec(
            num_scalar_prefetch=0,
            grid=(grid_steps,),
            in_specs=[
                pl.BlockSpec((3, tile), lambda i: (0, i)),
                pl.BlockSpec((3, tile), lambda i: (0, i)),
            ],
            out_specs=pl.BlockSpec((1, 1), lambda i: (0, 0)),
            scratch_shapes=[pltpu.VMEM((1, tile), jnp.float32)],
        ),
        compiler_params=pltpu.CompilerParams(
            dimension_semantics=("arbitrary",),
            vmem_limit_bytes=32 * 1024 * 1024,
        ),
    )(p, t)
    return out[0, 0]


def _reference(pred, target):
    # Pure-JAX reference mirroring the PyTorch loops.
    B = pred.shape[0]
    tgt = target.reshape(B, NUM_JOINTS, 3).astype(jnp.float32)
    d = jnp.sqrt(jnp.sum((pred.astype(jnp.float32) - tgt) ** 2, axis=-1))
    return jnp.mean(jnp.mean(d, axis=1))


if __name__ == "__main__":
    key = jax.random.PRNGKey(0)
    k1, k2, k3, k4 = jax.random.split(key, 4)

    # Small-B path (whole-array kernel).
    B = 2
    pred = jax.random.normal(k1, (B, NUM_JOINTS, 3), dtype=jnp.float32)
    target = jax.random.normal(k2, (B, NUM_JOINTS * 3), dtype=jnp.float32)
    loss = jax.block_until_ready(get_dis_loss(pred, target))
    ref = _reference(pred, target)
    assert jnp.allclose(loss, ref, rtol=1e-5, atol=1e-5), (loss, ref)

    # Gridded accumulator path (forced, with a ragged final tile: 336 = 2*128 + 80).
    B2 = 16
    pred2 = jax.random.normal(k3, (B2, NUM_JOINTS, 3), dtype=jnp.float32)
    target2 = jax.random.normal(k4, (B2, NUM_JOINTS * 3), dtype=jnp.float32)
    loss2 = jax.block_until_ready(
        get_dis_loss(pred2, target2, tile_joints=128, whole_array_vmem_budget=0))
    ref2 = _reference(pred2, target2)
    assert jnp.allclose(loss2, ref2, rtol=1e-5, atol=1e-5), (loss2, ref2)

    # bf16 inputs stay bf16 in HBM and are upcast in-kernel.
    loss3 = jax.block_until_ready(
        get_dis_loss(pred.astype(jnp.bfloat16), target.astype(jnp.bfloat16)))
    ref3 = _reference(pred.astype(jnp.bfloat16), target.astype(jnp.bfloat16))
    assert jnp.allclose(loss3, ref3, rtol=2e-2, atol=2e-2), (loss3, ref3)

    print("KERNEL_OK")
</pallas_src>

<mosaic_0001>
module attributes {stable_mosaic.version = 11 : i64} {
  func.func @_dis_loss_kernel_whole(%arg0: memref<3x42xf32, #tpu.memory_space<vmem>>, %arg1: memref<3x42xf32, #tpu.memory_space<vmem>>, %arg2: memref<1x1xf32, #tpu.memory_space<smem>>) attributes {dimension_semantics = [], scalar_prefetch = 0 : i64, scratch_operands = 0 : i64, tpu.core_type = #tpu.core_type<tc>} {
    %c0 = arith.constant 0 : index
    %c0_0 = arith.constant 0 : index
    %0 = vector.load %arg0[%c0, %c0_0] : memref<3x42xf32, #tpu.memory_space<vmem>>, vector<3x42xf32>
    %c0_1 = arith.constant 0 : index
    %c0_2 = arith.constant 0 : index
    %1 = vector.load %arg1[%c0_1, %c0_2] : memref<3x42xf32, #tpu.memory_space<vmem>>, vector<3x42xf32>
    %2 = arith.subf %0, %1 : vector<3x42xf32>
    %3 = arith.mulf %2, %2 : vector<3x42xf32>
    %cst = arith.constant dense<0.000000e+00> : vector<42xf32>
    %4 = vector.multi_reduction <add>, %3, %cst [0] : vector<3x42xf32> to vector<42xf32>
    %5 = vector.shape_cast %4 : vector<42xf32> to vector<1x42xf32>
    %6 = math.sqrt %5 : vector<1x42xf32>
    %7 = vector.shape_cast %6 : vector<1x42xf32> to vector<1x1x42xf32>
    %cst_3 = arith.constant dense<0.000000e+00> : vector<1xf32>
    %8 = vector.multi_reduction <add>, %7, %cst_3 [1, 2] : vector<1x1x42xf32> to vector<1xf32>
    %9 = vector.shape_cast %8 : vector<1xf32> to vector<1x1x1xf32>
    %10 = vector.extract %9[0, 0, 0] : f32 from vector<1x1x1xf32>
    %cst_4 = arith.constant 0.0238095243 : f32
    %11 = arith.mulf %10, %cst_4 : f32
    %c0_5 = arith.constant 0 : index
    %c0_6 = arith.constant 0 : index
    %12 = memref.load %arg2[%c0_5, %c0_6] : memref<1x1xf32, #tpu.memory_space<smem>>
    memref.store %11, %arg2[%c0_5, %c0_6] : memref<1x1xf32, #tpu.memory_space<smem>>
    return
  }
}

</mosaic_0001>

<bundles_post_ra>
// kernel: tpu_custom_call.1
= control target key start
LH: loop header
LB: loop body
LE: loop exit
PB: predicated region body
PF: predicated region fallthrough
CT: control target
= control target key end

     0   :  { %7 = vsyncpa [#allocation3], 0  ;;  %s205_s0 = inlined_call_operand.hbm [shape: f32[3,42], index: 0, kind: input, shape index: {}]   ;;  %s206_s1 = inlined_call_operand.hbm [shape: f32[3,42], index: 1, kind: input, shape index: {}]   ;;  %s207_s2 = inlined_call_operand.hbm [shape: f32[1,1], index: 2, kind: output, shape index: {}]  }
   0x1   :  { %8 = vsyncpa [#allocation6], 0 }
   0x2   :  { %9 = vsyncpa [#allocation4], 0  ;;  %s151_s9 = smov [#allocation2]   ;;  %s152_s11 = smov [#allocation5]  }
   0x3   :  { %s16_s10 = sshll.u32 %s151_s9, 4  ;;  %s26_s12 = sshll.u32 %s152_s11, 4  ;;  %s17_s10 = int_to_ptr.vmem [resolvable:$true] %s16_s10  ;;  %s27_s12 = int_to_ptr.vmem [resolvable:$true] %s26_s12 }
   0x4   :  { %s91_s15 = scalar_lea.hbm %s205_s0, 64 }
   0x5   :  { %p92_p0 = scmp.ne.s32.totalorder %s205_s0, %s91_s15  ;;  %p95_p1 = scmp.lt.u32.totalorder %s91_s15, %s205_s0 }
   0x7   :  { %p97_p2 = pnand %p95_p1, %p92_p0 }
   0x9   :  { %100 = shalt.err (!%p97_p2)
}
   0xa   :  { %s101_s20 = scalar_lea.vmem %s17_s10, 64  ;;  %p106_p4 = scmp.lt.s32.totalorder %s17_s10, %s17_s10 }
   0xb   :  { %p102_p3 = scmp.ne.s32.totalorder %s17_s10, %s101_s20  ;;  %p107_p5 = scmp.lt.s32.totalorder %s101_s20, %s101_s20 }
   0xd   :  { %p108_p6 = por %p107_p5, %p106_p4 }
   0xf   :  { %p109_p7 = pnand %p108_p6, %p102_p3 }
  0x11   :  { %112 = shalt.err (!%p109_p7)
}
  0x12   :  { %19 = dma.hbm_to_vmem [thread:$0]  %s205_s0, 64, %s17_s10, [#allocation3]  }
  0x13   :  { %s113_s25 = scalar_lea.hbm %s206_s1, 64 }
  0x14   :  { %p114_p8 = scmp.ne.s32.totalorder %s206_s1, %s113_s25  ;;  %p117_p9 = scmp.lt.u32.totalorder %s113_s25, %s206_s1 }
  0x16   :  { %p119_p10 = pnand %p117_p9, %p114_p8 }
  0x18   :  { %122 = shalt.err (!%p119_p10)
}
  0x19   :  { %s123_s30 = scalar_lea.vmem %s27_s12, 64  ;;  %p128_p12 = scmp.lt.s32.totalorder %s27_s12, %s27_s12 }
  0x1a   :  { %p124_p11 = scmp.ne.s32.totalorder %s27_s12, %s123_s30  ;;  %p129_p13 = scmp.lt.s32.totalorder %s123_s30, %s123_s30 }
  0x1c   :  { %p130_p0 = por %p129_p13, %p128_p12 }
  0x1e   :  { %p131_p1 = pnand %p130_p0, %p124_p11 }
  0x20   :  { %134 = shalt.err (!%p131_p1)
}
  0x21   :  { %29 = dma.hbm_to_vmem [thread:$0]  %s206_s1, 64, %s27_s12, [#allocation6]  }
  0x22   :  { %145 = dma.done.wait [#allocation3], 64  }
  0x23   :  { %146 = vsyncadd [#allocation3], 4294967232 }
  0x24   :  { %147 = dma.done.wait [#allocation6], 64  }
  0x25   :  { %148 = vsyncadd [#allocation6], 4294967232  ;;  %v36_v0 = vld [vmem:[#allocation2] sm:$0x7]  ;;  %v37_v1 = vld [vmem:[#allocation5] sm:$0x7] }
  0x26   :  { %v38_v2 = vsub.f32 %v36_v0, %v37_v1  ;;  %vm40_vm0 = vcmask 337920   ;;  %vm55_vm3 = vcmask 335872   ;;  %s135_s7 = scalar_lea.hbm %s207_s2, 16 }
  0x27   :  { %p136_p2 = scmp.ne.s32.totalorder %s207_s2, %s135_s7  ;;  %p139_p3 = scmp.lt.u32.totalorder %s135_s7, %s207_s2 }
  0x28   :  { %v39_v3 = vmul.f32 %v38_v2, %v38_v2 }
  0x29   :  { %p141_p4 = pnand %p139_p3, %p136_p2 }
  0x2a   :  { %v41_v4 = vsel %vm40_vm0, %v39_v3, 0.0 }
  0x2b   :  { %v42_v5 = vrot.slane %v41_v4, 4 }
  0x2d   :  { %v43_v6 = vadd.f32 %v42_v5, %v41_v4 }
  0x2f   :  { %v44_v7 = vrot.slane %v43_v6, 2 }
  0x31   :  { %v45_v8 = vadd.f32 %v44_v7, %v43_v6 }
  0x33   :  { %v46_v9 = vrot.slane %v45_v8, 1 }
  0x35   :  { %v47_v10 = vadd.f32 %v46_v9, %v45_v8 }
  0x37   :  { %89 = vrsqrt.f32 %v47_v10  ;;  %vm50_vm1 = vcmp.eq.f32.partialorder %v47_v10, inf  ;;  %v53_v12 = vand.u32 2147483648, %v47_v10  ;;  %vm52_vm2 = vcmp.eq.f32.partialorder %v47_v10, 0.0 }
  0x41   :  { %v90_v11 = vpop.eup %89 }
  0x42   :  { %v49_v13 = vmul.f32 %v90_v11, %v47_v10 }
  0x44   :  { %v51_v14 = vsel %vm50_vm1, %v47_v10, %v49_v13 }
  0x45   :  { %v54_v15 = vsel %vm52_vm2, %v53_v12, %v51_v14 }
  0x46   :  { %v56_v16 = vsel %vm55_vm3, %v54_v15, 0.0 }
  0x47   :  { %57 = vadd.xlane.f32.xlu0 %v56_v16 }
  0xd4   :  { %v58_v17 = vpop.xlane.xlu0 %57 }
  0xd5   :  { %v59_v18 = vrot.slane %v58_v17, 4 }
  0xd7   :  { %v60_v19 = vadd.f32 %v59_v18, %v58_v17 }
  0xd9   :  { %v61_v20 = vrot.slane %v60_v19, 2 }
  0xdb   :  { %v62_v21 = vadd.f32 %v61_v20, %v60_v19 }
  0xdd   :  { %v63_v22 = vrot.slane %v62_v21, 1 }
  0xdf   :  { %v64_v23 = vadd.f32 %v63_v22, %v62_v21 }
  0xe1   :  { %84 = vpush %v64_v23 }
 0x112   :  { %s85_s1 = spop %84 }
 0x113   :  { %s66_s4 = smul.f32 0.023809524, %s85_s1 }
 0x115   :  { %68 = sst [smem:[#allocation7]] %s66_s4 }
 0x116   :  { %144 = shalt.err (!%p141_p4)
}
 0x117   :  { %s153_s12 = smov [#allocation7]  }
 0x118   :  { %76 = dma.smem_to_hbm %s153_s12, 16, %s207_s2, [#allocation4]  }
 0x119   :  { %149 = dma.done.wait [#allocation4], 16  }
 0x11a   :  { %150 = vsyncadd [#allocation4], 4294967280 }
 0x11b   :  { %80 = sfence }
 0x11c   :  { %81 = vsyncpa [#allocation3], 1 }
 0x11d   :  { %82 = vsyncpa [#allocation6], 1 }
 0x11e   :  { %83 = vsyncpa [#allocation4], 1 }

</bundles_post_ra>
